<compile_context>
chip_gen: v5e
topology: v5e:2x2
jax: 0.10.0
libtpu: 0.0.40
codegen_flags: <defaults>
</compile_context>

<pallas_src>
import functools

import jax
import jax.numpy as jnp
import numpy as np
from jax import lax
from jax.experimental import pallas as pl
from jax.experimental.pallas import tpu as pltpu


# ---------------------------------------------------------------------------
# Kernels
# ---------------------------------------------------------------------------
def _expand_relu(x, w1, b1, mm_dtype):
  """1x1 expansion conv (BN scale pre-folded into w1) + bias + ReLU, f32 out."""
  h = jnp.dot(x.astype(mm_dtype), w1, preferred_element_type=jnp.float32)
  return jnp.maximum(h + b1, 0.0)


def _ir_kernel_stride1(x_ref, halo_ref, w1_ref, b1_ref, dw_ref, b2_ref, w3_ref,
                       o_ref, *, res_connect):
  mm_dtype = w1_ref.dtype
  x = x_ref[0]                                        # (T, C_in) f32
  li = pl.program_id(1)
  nl = pl.num_programs(1)

  w1 = w1_ref[...]
  b1 = b1_ref[...]
  h = _expand_relu(x, w1, b1, mm_dtype)               # (T, H) f32

  # Hidden activations of the one-row halo on each side of the tile.  At the
  # true sequence boundaries they must be exactly zero (conv zero-padding pads
  # the *hidden* stream), so mask them with the tile index.
  hh = _expand_relu(halo_ref[0, 0], w1, b1, mm_dtype)  # (2, H)
  h_prev = hh[0:1, :] * (li > 0).astype(jnp.float32)
  h_next = hh[1:2, :] * (li < nl - 1).astype(jnp.float32)

  # 3-tap depthwise conv (BN scale pre-folded into dw) + bias + ReLU.
  dw = dw_ref[...]
  h_m1 = jnp.concatenate([h_prev, h[:-1, :]], axis=0)   # h[l-1]
  h_p1 = jnp.concatenate([h[1:, :], h_next], axis=0)    # h[l+1]
  d = h_m1 * dw[0:1, :] + h * dw[1:2, :] + h_p1 * dw[2:3, :]
  d = jnp.maximum(d + b2_ref[...], 0.0)

  # 1x1 projection conv.
  out = jnp.dot(d.astype(mm_dtype), w3_ref[...],
                preferred_element_type=jnp.float32)
  if res_connect:
    out = out + x
  o_ref[0] = out.astype(o_ref.dtype)


def _ir_kernel_stride2(xe_ref, xo_ref, halo_ref, w1_ref, b1_ref, dw_ref, b2_ref,
                       w3_ref, o_ref):
  mm_dtype = w1_ref.dtype
  xe = xe_ref[0]                                      # (T/2, C_in) rows 0,2,4,...
  xo = xo_ref[0]                                      # (T/2, C_in) rows 1,3,5,...
  li = pl.program_id(1)

  w1 = w1_ref[...]
  b1 = b1_ref[...]
  he = _expand_relu(xe, w1, b1, mm_dtype)             # h at even positions
  ho = _expand_relu(xo, w1, b1, mm_dtype)             # h at odd positions

  # h at global position (tile_start - 1); zero at the sequence start.
  halo = halo_ref[0, 0]                               # (2, C_in); row 0 = prev
  hp = _expand_relu(halo[0:1, :], w1, b1, mm_dtype)
  hp = hp * (li > 0).astype(jnp.float32)

  # Depthwise conv evaluated only at even (kept) output positions:
  #   d[j] = h[2j-1]*w0 + h[2j]*w1 + h[2j+1]*w2
  dw = dw_ref[...]
  ho_m1 = jnp.concatenate([hp, ho[:-1, :]], axis=0)   # h[2j-1]
  d = ho_m1 * dw[0:1, :] + he * dw[1:2, :] + ho * dw[2:3, :]
  d = jnp.maximum(d + b2_ref[...], 0.0)

  out = jnp.dot(d.astype(mm_dtype), w3_ref[...],
                preferred_element_type=jnp.float32)
  o_ref[0] = out.astype(o_ref.dtype)


# ---------------------------------------------------------------------------
# Wrapper
# ---------------------------------------------------------------------------
def _choose_l_tile(L, stride, max_l_tile):
  """Largest divisor of L that is <= max_l_tile and sublane/stride friendly."""
  if L <= max_l_tile:
    return L
  step = 16 if stride == 2 else 8     # keeps blocks (and half-blocks) 8-aligned
  for t in range(max_l_tile - (max_l_tile % step), 0, -step):
    if L % t == 0:
      return t
  return L  # fallback: whole length as one block (always a legal full-dim block)


@functools.partial(jax.jit, static_argnames=("stride", "matmul_dtype", "max_l_tile"))
def inverted_residual_pallas(x_nlc, params, *, stride, matmul_dtype=jnp.bfloat16,
                             max_l_tile=512):
  """x_nlc: (N, L, C_in) float32.  params: folded weights (see make_params).

  max_l_tile=512 keeps the (L_tile, H) f32 intermediates to a few MiB even for
  large H, which fits v7x's 64 MiB VMEM with double-buffering headroom; it can
  be raised on v5e/v6e (128 MiB VMEM) if per-step overhead shows in profiles.
  """
  N, L, C_in = x_nlc.shape
  H = params["w1"].shape[1]
  C_out = params["w3"].shape[1]
  res_connect = (stride == 1) and (C_in == C_out)

  if stride == 2 and L % 2 != 0:
    raise ValueError("stride-2 path requires an even input length")
  L_out = L if stride == 1 else L // 2

  L_tile = _choose_l_tile(L, stride, max_l_tile)
  num_tiles = L // L_tile

  # Fold the BN scales into the conv weights (one-time, wrapper side) and cast
  # the matmul weights to the MXU dtype.  Depthwise taps / biases stay f32.
  w1 = params["w1"].astype(matmul_dtype)        # (C_in, H), BN1 scale folded
  b1 = params["b1"]                             # (1, H)
  dw = params["dw"]                             # (3, H),   BN2 scale folded
  b2 = params["b2"]                             # (1, H)
  w3 = params["w3"].astype(matmul_dtype)        # (H, C_out)

  # Per-tile halo rows: x[tile_start - 1] and x[tile_start + L_tile].
  # (Zero rows at the sequence ends; the kernel re-zeros the corresponding
  # *hidden* rows so they match the depthwise conv's zero padding.)
  x_pad = jnp.pad(x_nlc, ((0, 0), (1, 1), (0, 0)))
  starts = jnp.arange(num_tiles) * L_tile
  prev_rows = x_pad[:, starts, :]                      # (N, num_tiles, C_in)
  next_rows = x_pad[:, starts + L_tile + 1, :]         # (N, num_tiles, C_in)
  halo = jnp.stack([prev_rows, next_rows], axis=2)     # (N, num_tiles, 2, C_in)

  weight_specs = [
      pl.BlockSpec((C_in, H), lambda b, l: (0, 0)),    # w1 (scale-folded)
      pl.BlockSpec((1, H), lambda b, l: (0, 0)),       # b1
      pl.BlockSpec((3, H), lambda b, l: (0, 0)),       # dw (scale-folded)
      pl.BlockSpec((1, H), lambda b, l: (0, 0)),       # b2
      pl.BlockSpec((H, C_out), lambda b, l: (0, 0)),   # w3
  ]
  halo_spec = pl.BlockSpec((1, 1, 2, C_in), lambda b, l: (b, l, 0, 0))

  if stride == 1:
    kernel = functools.partial(_ir_kernel_stride1, res_connect=res_connect)
    in_specs = [pl.BlockSpec((1, L_tile, C_in), lambda b, l: (b, l, 0)),
                halo_spec] + weight_specs
    args = (x_nlc, halo, w1, b1, dw, b2, w3)
    out_block = (1, L_tile, C_out)
  else:
    # Split x into even / odd rows in the wrapper (cheap on the narrow
    # pre-expansion tensor); the kernel then only ever touches kept positions.
    x_r = x_nlc.reshape(N, L // 2, 2, C_in)
    x_even = x_r[:, :, 0, :]
    x_odd = x_r[:, :, 1, :]
    T2 = L_tile // 2
    kernel = _ir_kernel_stride2
    in_specs = [pl.BlockSpec((1, T2, C_in), lambda b, l: (b, l, 0)),
                pl.BlockSpec((1, T2, C_in), lambda b, l: (b, l, 0)),
                halo_spec] + weight_specs
    args = (x_even, x_odd, halo, w1, b1, dw, b2, w3)
    out_block = (1, T2, C_out)

  # TODO(synk): for very small channel counts the output store is lane-masked
  # (C_out < 128); making channels lane-dense (padding to 128 / restructuring
  # the surrounding model layout) is left to the caller.
  out_spec = pl.BlockSpec(out_block, lambda b, l: (b, l, 0))

  return pl.pallas_call(
      kernel,
      out_shape=jax.ShapeDtypeStruct((N, L_out, C_out), jnp.float32),
      grid_spec=pltpu.PrefetchScalarGridSpec(
          num_scalar_prefetch=0,
          grid=(N, num_tiles),
          in_specs=in_specs,
          out_specs=out_spec),
      compiler_params=pltpu.CompilerParams(
          dimension_semantics=("parallel", "parallel"),
          vmem_limit_bytes=32 * 1024 * 1024),
  )(*args)


# ---------------------------------------------------------------------------
# Pure-JAX reference in PyTorch's NCL layout (for correctness cross-check).
# ---------------------------------------------------------------------------
def reference_ncl(x_ncl, raw, *, stride, eps=1e-5):
  w1, g1, bt1, m1, v1, dw, g2, bt2, m2, v2, w3 = raw
  in_c = x_ncl.shape[1]
  out_c = w3.shape[0]
  res_connect = (stride == 1) and (in_c == out_c)

  def bn(y, g, bt, m, v):
    return ((y - m[None, :, None]) / jnp.sqrt(v[None, :, None] + eps)
            * g[None, :, None] + bt[None, :, None])

  y = lax.conv_general_dilated(x_ncl, w1, (1,), "VALID",
                               dimension_numbers=("NCH", "OIH", "NCH"))
  y = jnp.maximum(bn(y, g1, bt1, m1, v1), 0.0)
  y = lax.conv_general_dilated(y, dw, (stride,), [(1, 1)],
                               dimension_numbers=("NCH", "OIH", "NCH"),
                               feature_group_count=dw.shape[0])
  y = jnp.maximum(bn(y, g2, bt2, m2, v2), 0.0)
  y = lax.conv_general_dilated(y, w3, (1,), "VALID",
                               dimension_numbers=("NCH", "OIH", "NCH"))
  if res_connect:
    y = y + x_ncl
  return y


def make_params(key, in_c, out_c, expand_ratio, eps=1e-5):
  """Synthetic parameters in PyTorch shapes, plus the folded NLC versions
  (BN folded to inference form; BN scales folded into the conv weights)."""
  H = in_c * expand_ratio
  ks = jax.random.split(key, 11)
  w1 = jax.random.normal(ks[0], (H, in_c, 1), jnp.float32) * 0.3     # OIH
  g1 = jax.random.uniform(ks[1], (H,), jnp.float32, 0.5, 1.5)
  bt1 = jax.random.normal(ks[2], (H,), jnp.float32) * 0.1
  m1 = jax.random.normal(ks[3], (H,), jnp.float32) * 0.1
  v1 = jax.random.uniform(ks[4], (H,), jnp.float32, 0.5, 1.5)
  dw = jax.random.normal(ks[5], (H, 1, 3), jnp.float32) * 0.3        # OIH
  g2 = jax.random.uniform(ks[6], (H,), jnp.float32, 0.5, 1.5)
  bt2 = jax.random.normal(ks[7], (H,), jnp.float32) * 0.1
  m2 = jax.random.normal(ks[8], (H,), jnp.float32) * 0.1
  v2 = jax.random.uniform(ks[9], (H,), jnp.float32, 0.5, 1.5)
  w3 = jax.random.normal(ks[10], (out_c, H, 1), jnp.float32) * 0.3   # OIH

  raw = (w1, g1, bt1, m1, v1, dw, g2, bt2, m2, v2, w3)

  s1 = g1 / jnp.sqrt(v1 + eps)
  b1 = bt1 - m1 * s1
  s2 = g2 / jnp.sqrt(v2 + eps)
  b2 = bt2 - m2 * s2
  folded = dict(
      w1=jnp.transpose(w1[:, :, 0]) * s1[None, :],    # (C_in, H), scale folded
      b1=b1.reshape(1, H),
      dw=jnp.transpose(dw[:, 0, :]) * s2[None, :],    # (3, H),    scale folded
      b2=b2.reshape(1, H),
      w3=jnp.transpose(w3[:, :, 0]),                  # (H, C_out)
  )
  return raw, folded


if __name__ == "__main__":
  key = jax.random.PRNGKey(0)
  kx, kp1, kp2 = jax.random.split(key, 3)

  def check(x_nlc, raw, folded, stride, mm_dtype, max_l_tile, rtol, atol):
    out = inverted_residual_pallas(x_nlc, folded, stride=stride,
                                   matmul_dtype=mm_dtype, max_l_tile=max_l_tile)
    out = jax.block_until_ready(out)
    ref = reference_ncl(jnp.transpose(x_nlc, (0, 2, 1)), raw, stride=stride)
    ref = jnp.transpose(ref, (0, 2, 1))                       # back to NLC
    np.testing.assert_allclose(np.asarray(out), np.asarray(ref),
                               rtol=rtol, atol=atol)

  N = 2
  in_c, out_c, expand = 8, 8, 4            # residual case (stride 1)
  in_c2, out_c2, expand2 = 8, 16, 4        # no-residual case (stride 2)
  raw1, folded1 = make_params(kp1, in_c, out_c, expand)
  raw2, folded2 = make_params(kp2, in_c2, out_c2, expand2)

  # Single L-tile, exact f32 matmul path (tight tolerance).
  x16 = jax.random.normal(kx, (N, 16, in_c), jnp.float32)
  check(x16, raw1, folded1, 1, jnp.float32, 512, 1e-4, 1e-4)
  x16b = jax.random.normal(jax.random.fold_in(kx, 1), (N, 16, in_c2), jnp.float32)
  check(x16b, raw2, folded2, 2, jnp.float32, 512, 1e-4, 1e-4)

  # Multi-tile along L (exercises halo rows + boundary masking), f32 path.
  x32 = jax.random.normal(jax.random.fold_in(kx, 2), (N, 32, in_c), jnp.float32)
  check(x32, raw1, folded1, 1, jnp.float32, 8, 1e-4, 1e-4)     # 4 tiles of 8
  x32b = jax.random.normal(jax.random.fold_in(kx, 3), (N, 32, in_c2), jnp.float32)
  check(x32b, raw2, folded2, 2, jnp.float32, 16, 1e-4, 1e-4)   # 2 tiles of 16

  # bf16 MXU path (f32 accumulation) -> looser tolerance.
  check(x32, raw1, folded1, 1, jnp.bfloat16, 8, 5e-2, 2e-1)
  check(x32b, raw2, folded2, 2, jnp.bfloat16, 16, 5e-2, 2e-1)

  print("KERNEL_OK")
</pallas_src>

<mosaic_0001>
module attributes {stable_mosaic.version = 11 : i64} {
  func.func @_ir_kernel_stride1(%arg0: i32, %arg1: i32, %arg2: memref<1x16x8xf32, #tpu.memory_space<vmem>>, %arg3: memref<1x1x2x8xf32, #tpu.memory_space<vmem>>, %arg4: memref<8x32xf32, #tpu.memory_space<vmem>>, %arg5: memref<1x32xf32, #tpu.memory_space<vmem>>, %arg6: memref<3x32xf32, #tpu.memory_space<vmem>>, %arg7: memref<1x32xf32, #tpu.memory_space<vmem>>, %arg8: memref<32x8xf32, #tpu.memory_space<vmem>>, %arg9: memref<1x16x8xf32, #tpu.memory_space<vmem>>) attributes {dimension_semantics = [#tpu.dimension_semantics<parallel>, #tpu.dimension_semantics<parallel>], iteration_bounds = array<i64: 2, 1>, scalar_prefetch = 0 : i64, scratch_operands = 0 : i64, tpu.core_type = #tpu.core_type<tc>, window_params = [{transform_indices = @transform_0, window_bounds = array<i64: 1, 16, 8>}, {transform_indices = @transform_1, window_bounds = array<i64: 1, 1, 2, 8>}, {pipeline_mode = #tpu.pipeline_mode<synchronous>, transform_indices = @transform_2, window_bounds = array<i64: 8, 32>}, {pipeline_mode = #tpu.pipeline_mode<synchronous>, transform_indices = @transform_3, window_bounds = array<i64: 1, 32>}, {pipeline_mode = #tpu.pipeline_mode<synchronous>, transform_indices = @transform_4, window_bounds = array<i64: 3, 32>}, {pipeline_mode = #tpu.pipeline_mode<synchronous>, transform_indices = @transform_5, window_bounds = array<i64: 1, 32>}, {pipeline_mode = #tpu.pipeline_mode<synchronous>, transform_indices = @transform_6, window_bounds = array<i64: 32, 8>}, {transform_indices = @transform_7, window_bounds = array<i64: 1, 16, 8>}]} {
    %c0 = arith.constant 0 : index
    %c0_0 = arith.constant 0 : index
    %c0_1 = arith.constant 0 : index
    %0 = vector.load %arg2[%c0, %c0_0, %c0_1] : memref<1x16x8xf32, #tpu.memory_space<vmem>>, vector<1x16x8xf32>
    %1 = vector.shape_cast %0 : vector<1x16x8xf32> to vector<16x8xf32>
    %c0_2 = arith.constant 0 : index
    %c0_3 = arith.constant 0 : index
    %2 = vector.load %arg4[%c0_2, %c0_3] : memref<8x32xf32, #tpu.memory_space<vmem>>, vector<8x32xf32>
    %c0_4 = arith.constant 0 : index
    %c0_5 = arith.constant 0 : index
    %3 = vector.load %arg5[%c0_4, %c0_5] : memref<1x32xf32, #tpu.memory_space<vmem>>, vector<1x32xf32>
    %cst = arith.constant dense<0.000000e+00> : vector<16x32xf32>
    %4 = tpu.matmul %1, %2, %cst {dimension_numbers = #tpu.dot_dimension_numbers<[1], [0], [0], [1], [0, 0, 1, 1], [], []>} : vector<16x8xf32>, vector<8x32xf32>, vector<16x32xf32> -> vector<16x32xf32>
    %5 = vector.broadcast %3 : vector<1x32xf32> to vector<16x32xf32>
    %6 = arith.addf %4, %5 : vector<16x32xf32>
    %cst_6 = arith.constant 0.000000e+00 : f32
    %7 = vector.broadcast %cst_6 : f32 to vector<16x32xf32>
    %8 = arith.maximumf %6, %7 : vector<16x32xf32>
    %c0_7 = arith.constant 0 : index
    %c0_8 = arith.constant 0 : index
    %c0_9 = arith.constant 0 : index
    %c0_10 = arith.constant 0 : index
    %9 = vector.load %arg3[%c0_7, %c0_8, %c0_9, %c0_10] : memref<1x1x2x8xf32, #tpu.memory_space<vmem>>, vector<1x1x2x8xf32>
    %10 = vector.shape_cast %9 : vector<1x1x2x8xf32> to vector<2x8xf32>
    %cst_11 = arith.constant dense<0.000000e+00> : vector<2x32xf32>
    %11 = tpu.matmul %10, %2, %cst_11 {dimension_numbers = #tpu.dot_dimension_numbers<[1], [0], [0], [1], [0, 0, 1, 1], [], []>} : vector<2x8xf32>, vector<8x32xf32>, vector<2x32xf32> -> vector<2x32xf32>
    %12 = vector.broadcast %3 : vector<1x32xf32> to vector<2x32xf32>
    %13 = arith.addf %11, %12 : vector<2x32xf32>
    %cst_12 = arith.constant 0.000000e+00 : f32
    %14 = vector.broadcast %cst_12 : f32 to vector<2x32xf32>
    %15 = arith.maximumf %13, %14 : vector<2x32xf32>
    %16 = vector.extract_strided_slice %15 {offsets = [0, 0], sizes = [1, 32], strides = [1, 1]} : vector<2x32xf32> to vector<1x32xf32>
    %c0_i32 = arith.constant 0 : i32
    %17 = arith.cmpi sgt, %arg1, %c0_i32 : i32
    %18 = arith.extui %17 : i1 to i32
    %19 = arith.sitofp %18 : i32 to f32
    %20 = vector.broadcast %19 : f32 to vector<1x32xf32>
    %21 = arith.mulf %16, %20 : vector<1x32xf32>
    %22 = vector.extract_strided_slice %15 {offsets = [1, 0], sizes = [1, 32], strides = [1, 1]} : vector<2x32xf32> to vector<1x32xf32>
    %c0_i32_13 = arith.constant 0 : i32
    %23 = arith.cmpi slt, %arg1, %c0_i32_13 : i32
    %24 = arith.extui %23 : i1 to i32
    %25 = arith.sitofp %24 : i32 to f32
    %26 = vector.broadcast %25 : f32 to vector<1x32xf32>
    %27 = arith.mulf %22, %26 : vector<1x32xf32>
    %c0_14 = arith.constant 0 : index
    %c0_15 = arith.constant 0 : index
    %28 = vector.load %arg6[%c0_14, %c0_15] : memref<3x32xf32, #tpu.memory_space<vmem>>, vector<3x32xf32>
    %29 = vector.extract_strided_slice %8 {offsets = [0, 0], sizes = [15, 32], strides = [1, 1]} : vector<16x32xf32> to vector<15x32xf32>
    %30 = tpu.concatenate %21, %29 in 0 : vector<1x32xf32>, vector<15x32xf32> -> vector<16x32xf32>
    %31 = vector.extract_strided_slice %8 {offsets = [1, 0], sizes = [15, 32], strides = [1, 1]} : vector<16x32xf32> to vector<15x32xf32>
    %32 = tpu.concatenate %31, %27 in 0 : vector<15x32xf32>, vector<1x32xf32> -> vector<16x32xf32>
    %33 = vector.extract_strided_slice %28 {offsets = [0, 0], sizes = [1, 32], strides = [1, 1]} : vector<3x32xf32> to vector<1x32xf32>
    %34 = vector.broadcast %33 : vector<1x32xf32> to vector<16x32xf32>
    %35 = arith.mulf %30, %34 : vector<16x32xf32>
    %36 = vector.extract_strided_slice %28 {offsets = [1, 0], sizes = [1, 32], strides = [1, 1]} : vector<3x32xf32> to vector<1x32xf32>
    %37 = vector.broadcast %36 : vector<1x32xf32> to vector<16x32xf32>
    %38 = arith.mulf %8, %37 : vector<16x32xf32>
    %39 = arith.addf %35, %38 : vector<16x32xf32>
    %40 = vector.extract_strided_slice %28 {offsets = [2, 0], sizes = [1, 32], strides = [1, 1]} : vector<3x32xf32> to vector<1x32xf32>
    %41 = vector.broadcast %40 : vector<1x32xf32> to vector<16x32xf32>
    %42 = arith.mulf %32, %41 : vector<16x32xf32>
    %43 = arith.addf %39, %42 : vector<16x32xf32>
    %c0_16 = arith.constant 0 : index
    %c0_17 = arith.constant 0 : index
    %44 = vector.load %arg7[%c0_16, %c0_17] : memref<1x32xf32, #tpu.memory_space<vmem>>, vector<1x32xf32>
    %45 = vector.broadcast %44 : vector<1x32xf32> to vector<16x32xf32>
    %46 = arith.addf %43, %45 : vector<16x32xf32>
    %cst_18 = arith.constant 0.000000e+00 : f32
    %47 = vector.broadcast %cst_18 : f32 to vector<16x32xf32>
    %48 = arith.maximumf %46, %47 : vector<16x32xf32>
    %c0_19 = arith.constant 0 : index
    %c0_20 = arith.constant 0 : index
    %49 = vector.load %arg8[%c0_19, %c0_20] : memref<32x8xf32, #tpu.memory_space<vmem>>, vector<32x8xf32>
    %cst_21 = arith.constant dense<0.000000e+00> : vector<16x8xf32>
    %50 = tpu.matmul %48, %49, %cst_21 {dimension_numbers = #tpu.dot_dimension_numbers<[1], [0], [0], [1], [0, 0, 1, 1], [], []>} : vector<16x32xf32>, vector<32x8xf32>, vector<16x8xf32> -> vector<16x8xf32>
    %51 = arith.addf %50, %1 : vector<16x8xf32>
    %c0_22 = arith.constant 0 : index
    %c0_23 = arith.constant 0 : index
    %c0_24 = arith.constant 0 : index
    %52 = vector.load %arg9[%c0_22, %c0_23, %c0_24] : memref<1x16x8xf32, #tpu.memory_space<vmem>>, vector<1x16x8xf32>
    %53 = vector.shape_cast %52 : vector<1x16x8xf32> to vector<16x8xf32>
    %54 = vector.shape_cast %51 : vector<16x8xf32> to vector<1x16x8xf32>
    tpu.vector_store %arg9[%c0_22, %c0_23, %c0_24], %54 {strides = array<i32>} : memref<1x16x8xf32, #tpu.memory_space<vmem>>, vector<1x16x8xf32>,
    return
  }
  func.func @transform_0(%arg0: i32, %arg1: i32) -> (i32, i32, i32) {
    %c0_i32 = arith.constant 0 : i32
    %c0_i32_0 = arith.constant 0 : i32
    return %arg0, %arg1, %c0_i32 : i32, i32, i32
  }
  func.func @transform_1(%arg0: i32, %arg1: i32) -> (i32, i32, i32, i32) {
    %c0_i32 = arith.constant 0 : i32
    %c0_i32_0 = arith.constant 0 : i32
    %c0_i32_1 = arith.constant 0 : i32
    return %arg0, %arg1, %c0_i32, %c0_i32_0 : i32, i32, i32, i32
  }
  func.func @transform_2(%arg0: i32, %arg1: i32) -> (i32, i32) {
    %c0_i32 = arith.constant 0 : i32
    %c0_i32_0 = arith.constant 0 : i32
    %c0_i32_1 = arith.constant 0 : i32
    return %c0_i32, %c0_i32_0 : i32, i32
  }
  func.func @transform_3(%arg0: i32, %arg1: i32) -> (i32, i32) {
    %c0_i32 = arith.constant 0 : i32
    %c0_i32_0 = arith.constant 0 : i32
    %c0_i32_1 = arith.constant 0 : i32
    return %c0_i32, %c0_i32_0 : i32, i32
  }
  func.func @transform_4(%arg0: i32, %arg1: i32) -> (i32, i32) {
    %c0_i32 = arith.constant 0 : i32
    %c0_i32_0 = arith.constant 0 : i32
    %c0_i32_1 = arith.constant 0 : i32
    return %c0_i32, %c0_i32_0 : i32, i32
  }
  func.func @transform_5(%arg0: i32, %arg1: i32) -> (i32, i32) {
    %c0_i32 = arith.constant 0 : i32
    %c0_i32_0 = arith.constant 0 : i32
    %c0_i32_1 = arith.constant 0 : i32
    return %c0_i32, %c0_i32_0 : i32, i32
  }
  func.func @transform_6(%arg0: i32, %arg1: i32) -> (i32, i32) {
    %c0_i32 = arith.constant 0 : i32
    %c0_i32_0 = arith.constant 0 : i32
    %c0_i32_1 = arith.constant 0 : i32
    return %c0_i32, %c0_i32_0 : i32, i32
  }
  func.func @transform_7(%arg0: i32, %arg1: i32) -> (i32, i32, i32) {
    %c0_i32 = arith.constant 0 : i32
    %c0_i32_0 = arith.constant 0 : i32
    return %arg0, %arg1, %c0_i32 : i32, i32, i32
  }
}

</mosaic_0001>

<bundles_post_ra>
// kernel: inverted_residual_pallas.1
= control target key start
LH: loop header
LB: loop body
LE: loop exit
PB: predicated region body
PF: predicated region fallthrough
CT: control target
= control target key end

     0   :  { %s712_s24 = smov 0   ;;  %s714_s25 = smov 0   ;;  %s795_s0 = inlined_call_operand.vmem [shape: f32[2,16,8], index: 0, kind: input, shape index: {}]   ;;  %s796_s1 = inlined_call_operand.vmem [shape: f32[2,1,2,8], index: 1, kind: input, shape index: {}]   ;;  %s797_s2 = inlined_call_operand.vmem [shape: f32[8,32], index: 2, kind: input, shape index: {}]   ;;  %s798_s3 = inlined_call_operand.vmem [shape: f32[1,32], index: 3, kind: input, shape index: {}]   ;;  %s799_s4 = inlined_call_operand.vmem [shape: f32[3,32], index: 4, kind: input, shape index: {}]   ;;  %s800_s5 = inlined_call_operand.vmem [shape: f32[1,32], index: 5, kind: input, shape index: {}]   ;;  %s801_s6 = inlined_call_operand.vmem [shape: f32[32,8], index: 6, kind: input, shape index: {}]   ;;  %s802_s7 = inlined_call_operand.vmem [shape: f32[2,16,8], index: 7, kind: output, shape index: {}]  }
   0x1   :  { %s716_s26 = smov 0  }
   0x2 LB: > { %s29_s27 = sadd.s32 1, %s666_s25  ;;  %p603_p0 = scmp.ge.s32.totalorder %s670_s26, 1  ;;  %s670_s26 = sphi %s716_s26, %s17_s26   ;;  %s666_s25 = sphi %s714_s25, %s804_s25   ;;  %s662_s24 = sphi %s712_s24, %s803_s24  }
   0x3   : > { %p31_p1 = scmp.ge.s32.totalorder %s29_s27, 2  ;;  %p272_p2 = scmp.lt.s32.totalorder %s670_s26, 3 }
   0x5   : > { %s806_s27 = smov (%p31_p1, %s29_s27), 0  ;;  %p273_p3 = pnand %p603_p0, %p272_p2 }
   0x6   : > { %p320_p4 = scmp.lt.s32.totalorder (!%p273_p3), %s662_s24, 1 }
   0x7   : > { %276 = sbr.rel (%p273_p3) target bundleno = 302 (0x12e), region = 48 }
   0xc   : > { %v348_v0 = vld [vmem:[%s797_s2] sm:$0xff]  ;;  %s808_s24 = smov (!%p320_p4, %s662_s24), 1  ;;  %vm353_vm0 = vcmask 64512   ;;  %v464_v4 = vld [vmem:[%s801_s6 + $0x18] sm:$0xff]  ;;  %v463_v5 = vld [vmem:[%s801_s6 + $0x10] sm:$0xff]  ;;  %vm423_vm1 = vcmask 1040384  }
   0xd   : > { %375 = vmatpush.msra.mxu0 %v348_v0  ;;  %404 = vmatpush.msra.mxu1 %v348_v0  ;;  %s616_s30 = sshll.u32 %s808_s24, 4  ;;  %s606_s8 = sshll.u32 %s808_s24, 1  ;;  %v462_v6 = vld [vmem:[%s801_s6 + $0x8] sm:$0xff]  ;;  %v461_v7 = vld [vmem:[%s801_s6] sm:$0xff]  ;;  %vm430_vm2 = vcmask 1046528   ;;  %vm465_vm3 = vcmask 261120  }
   0xe   : > { %s327_s11 = scalar_lea.vmem %s795_s0, %s616_s30  ;;  %s335_s14 = scalar_lea.vmem %s796_s1, %s606_s8  ;;  %484 = vmatpush.msra.mxu2 %v464_v4  ;;  %618 = vmatpush.msra.mxu3 %v464_v4  ;;  %v646_v8 = vld [vmem:[%s798_s3] ss:$0 sm:$0xff] }
   0xf   : > { %v742_v1 = vld [vmem:[%s327_s11] sm:$0xff]  ;;  %v750_v3 = vld [vmem:[%s327_s11 + $0x8] sm:$0xff]  ;;  %s344_s13 = scalar_lea.vmem %s802_s7, %s616_s30 }
  0x10   : > { %609 = vmatmul.msk.f32.vlgmr.msra.gmra.mxu0 %vm353_vm0, %v742_v1  ;;  %v385_v2 = vld [vmem:[%s335_s14] sm:$0x3]  ;;  %485 = vmatpush.msra.mxu2 %v463_v5 }
  0x11   : > { %611 = vmatmul.msk.f32.vlgmr.msra.gmra.mxu1 %vm353_vm0, %v385_v2  ;;  %619 = vmatpush.msra.mxu3 %v463_v5  ;;  %v420_v17 = vld [vmem:[%s799_s4] sm:$0x7] }
  0x12   : > { %486 = vmatpush.msra.mxu2 %v462_v6  ;;  %v440_v18 = vperm.slane %v420_v17, 0  ;;  %v443_v22 = vperm.slane %v420_v17, 1  ;;  %v448_v26 = vperm.slane %v420_v17, 2  ;;  %v647_v38 = vld [vmem:[%s800_s5] ss:$0 sm:$0xff] }
  0x13   : > { %620 = vmatpush.msra.mxu3 %v462_v6 }
  0x14   : > { %487 = vmatpush.msra.mxu2 %v461_v7 }
  0x15   : > { %621 = vmatpush.msra.mxu3 %v461_v7 }
  0x18   : > { %610 = vmatmul.msk.f32.gmra.mxu0 %vm353_vm0, %v750_v3 }
  0x8d   : > { %v377_v9 = vpop.f32.mrf.mxu0 }
  0x8e   : > { %v378_v10 = vadd.f32 %v646_v8, %v377_v9  ;;  %v406_v11 = vpop.f32.mrf.mxu1 }
  0x8f   : > { %v407_v12 = vadd.f32 %v646_v8, %v406_v11 }
  0x90   : > { %v383_v13 = vmax.f32 %v378_v10, 0.0 }
  0x91   : > { %v409_v14 = vmax.f32 %v407_v12, 0.0 }
  0x92   : > { %v424_v15 = vrot.slane %v383_v13, 7  ;;  %v431_v27 = vrot.slane %v383_v13, 1  ;;  %v444_v30 = vmul.f32 %v443_v22, %v383_v13 }
  0x93   : > { %v414_v16 = vmul.f32 0.0, %v409_v14 }
  0x95   : > { %v380_v19 = vpop.f32.mrf.mxu0  ;;  %v429_v20 = vsel %vm423_vm1, %v414_v16, %v424_v15  ;;  %v437_v23 = vrot.slane %v414_v16, 2 }
  0x96   : > { %v381_v21 = vadd.f32 %v646_v8, %v380_v19  ;;  %v441_v25 = vmul.f32 %v440_v18, %v429_v20 }
  0x98   : > { %v384_v24 = vmax.f32 %v381_v21, 0.0  ;;  %v446_v36 = vadd.f32 %v444_v30, %v441_v25 }
  0x9a   : > { %v425_v28 = vrot.slane %v384_v24, 7  ;;  %v432_v29 = vrot.slane %v384_v24, 1  ;;  %v445_v35 = vmul.f32 %v443_v22, %v384_v24 }
  0x9c   : > { %v426_v31 = vsel %vm423_vm1, %v424_v15, %v425_v28  ;;  %v433_v32 = vsel %vm430_vm2, %v431_v27, %v432_v29  ;;  %v439_v33 = vsel %vm430_vm2, %v432_v29, %v437_v23 }
  0x9d   : > { %v442_v34 = vmul.f32 %v440_v18, %v426_v31  ;;  %v449_v37 = vmul.f32 %v448_v26, %v433_v32  ;;  %v450_v41 = vmul.f32 %v448_v26, %v439_v33 }
  0x9f   : > { %v447_v39 = vadd.f32 %v445_v35, %v442_v34  ;;  %v451_v40 = vadd.f32 %v449_v37, %v446_v36 }
  0xa1   : > { %v457_v42 = vadd.f32 %v647_v38, %v451_v40  ;;  %v452_v43 = vadd.f32 %v450_v41, %v447_v39 }
  0xa3   : > { %v459_v44 = vmax.f32 %v457_v42, 0.0  ;;  %v458_v45 = vadd.f32 %v647_v38, %v452_v43 }
  0xa5   : > { %612 = vmatmul.msk.f32.vlgmr.msra.gmra.mxu2 %vm465_vm3, %v459_v44  ;;  %v460_v46 = vmax.f32 %v458_v45, 0.0 }
  0xa7   : > { %613 = vmatmul.msk.f32.vlgmr.msra.gmra.mxu3 %vm465_vm3, %v460_v46 }
 0x128   : > { %v489_v47 = vpop.f32.mrf.mxu2 }
 0x129   : > { %v490_v48 = vadd.f32 %v489_v47, %v742_v1 }
 0x12a   : > { %v492_v49 = vpop.f32.mrf.mxu3 }
 0x12b   : > { %495 = vst.msk [vmem:[%s344_s13] sm:$0xff] %vm353_vm0, %v490_v48  ;;  %v493_v50 = vadd.f32 %v492_v49, %v750_v3 }
 0x12d   : > { %496 = vst.msk [vmem:[%s344_s13 + $0x8] sm:$0xff] %vm353_vm0, %v493_v50 }
 0x12e PF: > { %s17_s26 = sadd.s32 1, %s670_s26   ;;  %s803_s24 = smov %s666_s25 }
 0x12f   : > { %p14_p5 = scmp.ge.s32.totalorder %s17_s26, 4   ;;  %s804_s25 = smov %s806_s27 }
 0x131   :  { %16 = sbr.rel (!%p14_p5) target bundleno = 2 (0x2), region = 81 }

</bundles_post_ra>
